<compile_context>
chip_gen: v5e
topology: v5e:2x2
jax: 0.10.0
libtpu: 0.0.40
codegen_flags: <defaults>
</compile_context>

<pallas_src>
import jax
import jax.numpy as jnp
import numpy as np
from jax.experimental import pallas as pl
from jax.experimental.pallas import tpu as pltpu


def _cdiv(a, b):
    return (a + b - 1) // b


def _round_up(a, b):
    return _cdiv(a, b) * b


def _pick_batch_block(batch, c, n, vmem_budget_bytes=8 * 1024 * 1024):
    """Largest multiple-of-128 batch block whose double-buffered f32 blocks
    (x, out, w) fit the VMEM budget.  8 MiB is conservative vs. v5e's 16 MiB
    default scoped VMEM (v6e/v7x default to 32 MiB).  Never drops below 128
    lanes, so there is no bb=1 performance cliff for odd/prime batch sizes.
    """
    bytes_per_batch = 2 * (2 * c * n + n) * 4          # 2x = double buffering
    max_bb = max(128, (vmem_budget_bytes // bytes_per_batch) // 128 * 128)
    bb = min(max_bb, _round_up(batch, 128))
    # Keep >= 2 grid steps once the batch is large enough, so the "parallel"
    # batch axis can be sharded across v7x's two TensorCores.
    if batch > 256 and _cdiv(batch, bb) < 2:
        bb = max(128, min(bb, _round_up(_cdiv(batch, 2), 128)))
    return bb


def gcn_block_kernel(wt_ref, shift_ref, w_ref, x_ref, o_ref):
    """One batch block of the GCN forward, batch on the lane axis.

    wt_ref   : SMEM (C_out, C_in) f32  conv weight with BN scale folded in
    shift_ref: SMEM (C_out,)      f32  conv bias + BN shift folded together
    w_ref    : VMEM (N, bb)       f32  attention logits (nodes x batch)
    x_ref    : VMEM (C_in, N, bb) f32  node features    (chan x nodes x batch)
    o_ref    : VMEM (C_out, N, bb) f32
    """
    c_out, c_in = wt_ref.shape
    n = x_ref.shape[1]

    # attention(w): relu(tanh(w)); bmm(w^T, w) collapses to a per-batch scalar
    # s living on lanes as a (1, bb) row.
    t = jnp.maximum(jnp.tanh(w_ref[...]), 0.0)            # (N, bb)
    s = jnp.sum(t * t, axis=0, keepdims=True)             # (1, bb)

    # L = (s*ones + I) / (N*s + 1)  =>  L @ X = (s * node_sum + X) / (N*s + 1)
    inv = pl.reciprocal(n * s + 1.0, approx=False)         # (1, bb)  EUP

    # Per-input-channel aggregated features; everything stays 2D (N, bb) with
    # cheap sublane reductions / sublane broadcasts of lane-aligned rows.
    ys = []
    for ci in range(c_in):
        xc = x_ref[ci]                                     # (N, bb)
        node_sum = jnp.sum(xc, axis=0, keepdims=True)      # (1, bb)
        ys.append((s * node_sum + xc) * inv)               # (N, bb)

    # 1x1 conv (+ folded BN affine) + ReLU as VPU FMAs with scalar weights
    # from SMEM, pairwise-tree accumulation.  Switch to one MXU jnp.dot if
    # the channel count grows to ~32 or more.
    for o in range(c_out):
        terms = [ys[ci] * wt_ref[o, ci] for ci in range(c_in)]
        while len(terms) > 1:
            nxt = [terms[i] + terms[i + 1] for i in range(0, len(terms) - 1, 2)]
            if len(terms) % 2:
                nxt.append(terms[-1])
            terms = nxt
        z = terms[0] + shift_ref[o]
        o_ref[o] = jnp.maximum(z, 0.0).astype(o_ref.dtype)


def gcn_block_forward(x, w, conv_w, conv_b, bn_gamma, bn_beta, bn_mean, bn_var,
                      eps=1e-5):
    """x: (B, C, N, 1) float32, w: (B, N) float32 -> (B, C, N, 1) float32."""
    B, C, N, _ = x.shape

    # Fold conv bias + inference-mode BatchNorm into the conv weight & a shift.
    inv_std = 1.0 / jnp.sqrt(bn_var.astype(jnp.float32) + eps)
    scale = bn_gamma.astype(jnp.float32) * inv_std                     # (C,)
    wt = conv_w.reshape(C, C).astype(jnp.float32) * scale[:, None]     # (Co,Ci)
    shift = ((conv_b.astype(jnp.float32) - bn_mean.astype(jnp.float32))
             * scale + bn_beta.astype(jnp.float32))                    # (C,)

    # Lane-dense relayout: batch on the lane axis (one-time wrapper transpose).
    x_t = jnp.transpose(x.reshape(B, C, N), (1, 2, 0)).astype(jnp.float32)
    w_t = jnp.transpose(w, (1, 0)).astype(jnp.float32)                 # (N, B)

    bb = _pick_batch_block(B, C, N)
    b_pad = _cdiv(B, bb) * bb
    if b_pad != B:
        x_t = jnp.pad(x_t, ((0, 0), (0, 0), (0, b_pad - B)))
        w_t = jnp.pad(w_t, ((0, 0), (0, b_pad - B)))

    out_t = pl.pallas_call(
        gcn_block_kernel,
        out_shape=jax.ShapeDtypeStruct((C, N, b_pad), jnp.float32),
        grid=(b_pad // bb,),
        in_specs=[
            pl.BlockSpec(memory_space=pltpu.MemorySpace.SMEM),     # folded W
            pl.BlockSpec(memory_space=pltpu.MemorySpace.SMEM),     # folded shift
            pl.BlockSpec((N, bb), lambda i: (0, i)),               # w (N, B)
            pl.BlockSpec((C, N, bb), lambda i: (0, 0, i)),         # x (C, N, B)
        ],
        out_specs=pl.BlockSpec((C, N, bb), lambda i: (0, 0, i)),
        compiler_params=pltpu.CompilerParams(
            dimension_semantics=("parallel",)),
    )(wt, shift, w_t, x_t)

    # Back to the module's NCHW layout (B, C, N, 1).
    out = jnp.transpose(out_t[:, :, :B], (2, 0, 1))[..., None]
    return out


def gcn_block_reference(x, w, conv_w, conv_b, bn_gamma, bn_beta, bn_mean,
                        bn_var, eps=1e-5):
    """Pure-JAX replica of the PyTorch forward, for validation."""
    B, C, N, _ = x.shape
    t = jnp.maximum(jnp.tanh(w), 0.0)[..., None]                # (B, N, 1)
    A = jnp.matmul(jnp.transpose(t, (0, 2, 1)), t)              # (B, 1, 1)
    A = A + jnp.eye(N, dtype=x.dtype)[None]                     # (B, N, N)
    d_out = jnp.sum(A, axis=-1)                                 # (B, N)
    d = (1.0 / d_out) ** 0.5
    L = d[..., :, None] * A * d[..., None, :]                   # D @ A @ D
    xt = jnp.transpose(x[..., 0], (0, 2, 1))                    # (B, N, C)
    out = jnp.matmul(L, xt)                                     # (B, N, C)
    out = jnp.transpose(out, (0, 2, 1))[..., None]              # (B, C, N, 1)
    z = jnp.einsum('bcnq,oc->bonq', out, conv_w.reshape(C, C)) + \
        conv_b.reshape(1, C, 1, 1)
    z = (z - bn_mean.reshape(1, C, 1, 1)) / jnp.sqrt(
        bn_var.reshape(1, C, 1, 1) + eps)
    z = z * bn_gamma.reshape(1, C, 1, 1) + bn_beta.reshape(1, C, 1, 1)
    return jnp.maximum(z, 0.0)


if __name__ == "__main__":
    key = jax.random.PRNGKey(0)
    kx, kw, kcw, kcb, kg, kb, km, kv, kx2, kw2 = jax.random.split(key, 10)

    C, N = 4, 16

    # Shapes from nn.Conv2d(C, C, 1) + nn.BatchNorm2d(C)
    conv_w = 0.1 * jax.random.normal(kcw, (C, C, 1, 1), dtype=jnp.float32)
    conv_b = 0.1 * jax.random.normal(kcb, (C,), dtype=jnp.float32)
    bn_gamma = 1.0 + 0.1 * jax.random.normal(kg, (C,), dtype=jnp.float32)
    bn_beta = 0.1 * jax.random.normal(kb, (C,), dtype=jnp.float32)
    bn_mean = 0.05 * jax.random.normal(km, (C,), dtype=jnp.float32)
    bn_var = 0.5 + 0.1 * jnp.abs(jax.random.normal(kv, (C,), dtype=jnp.float32))

    def run_case(key_x, key_w, batch):
        x = jax.random.normal(key_x, (batch, C, N, 1), dtype=jnp.float32)
        w = jax.random.normal(key_w, (batch, N), dtype=jnp.float32)
        out = jax.block_until_ready(
            gcn_block_forward(x, w, conv_w, conv_b, bn_gamma, bn_beta,
                              bn_mean, bn_var))
        ref = jax.block_until_ready(
            gcn_block_reference(x, w, conv_w, conv_b, bn_gamma, bn_beta,
                                bn_mean, bn_var))
        assert out.shape == (batch, C, N, 1), out.shape
        np.testing.assert_allclose(np.asarray(out), np.asarray(ref),
                                   rtol=1e-5, atol=1e-5)

    run_case(kx, kw, batch=2)        # small shape from the module spec
    run_case(kx2, kw2, batch=300)    # exercises batch padding + 2-step grid
    print("KERNEL_OK")
</pallas_src>

<mosaic_0001>
module attributes {stable_mosaic.version = 11 : i64} {
  func.func @gcn_block_kernel(%arg0: i32, %arg1: memref<4x4xf32, #tpu.memory_space<smem>>, %arg2: memref<4xf32, #tpu.memory_space<smem>>, %arg3: memref<16x128xf32, #tpu.memory_space<vmem>>, %arg4: memref<4x16x128xf32, #tpu.memory_space<vmem>>, %arg5: memref<4x16x128xf32, #tpu.memory_space<vmem>>) attributes {dimension_semantics = [#tpu.dimension_semantics<parallel>], iteration_bounds = array<i64: 1>, scalar_prefetch = 0 : i64, scratch_operands = 0 : i64, tpu.core_type = #tpu.core_type<tc>, window_params = [{transform_indices = @transform_0, window_bounds = array<i64: 4, 4>}, {transform_indices = @transform_1, window_bounds = array<i64: 4>}, {transform_indices = @transform_2, window_bounds = array<i64: 16, 128>}, {transform_indices = @transform_3, window_bounds = array<i64: 4, 16, 128>}, {transform_indices = @transform_4, window_bounds = array<i64: 4, 16, 128>}]} {
    %c0 = arith.constant 0 : index
    %c0_0 = arith.constant 0 : index
    %0 = vector.load %arg3[%c0, %c0_0] : memref<16x128xf32, #tpu.memory_space<vmem>>, vector<16x128xf32>
    %1 = math.tanh %0 : vector<16x128xf32>
    %cst = arith.constant 0.000000e+00 : f32
    %2 = vector.broadcast %cst : f32 to vector<16x128xf32>
    %3 = arith.maximumf %1, %2 : vector<16x128xf32>
    %4 = arith.mulf %3, %3 : vector<16x128xf32>
    %cst_1 = arith.constant dense<0.000000e+00> : vector<128xf32>
    %5 = vector.multi_reduction <add>, %4, %cst_1 [0] : vector<16x128xf32> to vector<128xf32>
    %6 = vector.shape_cast %5 : vector<128xf32> to vector<1x128xf32>
    %cst_2 = arith.constant 1.600000e+01 : f32
    %7 = vector.broadcast %cst_2 : f32 to vector<1x128xf32>
    %8 = arith.mulf %7, %6 : vector<1x128xf32>
    %cst_3 = arith.constant 1.000000e+00 : f32
    %9 = vector.broadcast %cst_3 : f32 to vector<1x128xf32>
    %10 = arith.addf %8, %9 : vector<1x128xf32>
    %11 = tpu.reciprocal %10 : vector<1x128xf32> -> vector<1x128xf32>
    %c0_4 = arith.constant 0 : index
    %c0_5 = arith.constant 0 : index
    %c0_6 = arith.constant 0 : index
    %12 = vector.load %arg4[%c0_4, %c0_5, %c0_6] : memref<4x16x128xf32, #tpu.memory_space<vmem>>, vector<1x16x128xf32>
    %13 = vector.shape_cast %12 : vector<1x16x128xf32> to vector<16x128xf32>
    %cst_7 = arith.constant dense<0.000000e+00> : vector<128xf32>
    %14 = vector.multi_reduction <add>, %13, %cst_7 [0] : vector<16x128xf32> to vector<128xf32>
    %15 = vector.shape_cast %14 : vector<128xf32> to vector<1x128xf32>
    %16 = arith.mulf %6, %15 : vector<1x128xf32>
    %17 = vector.broadcast %16 : vector<1x128xf32> to vector<16x128xf32>
    %18 = arith.addf %17, %13 : vector<16x128xf32>
    %19 = vector.broadcast %11 : vector<1x128xf32> to vector<16x128xf32>
    %20 = arith.mulf %18, %19 : vector<16x128xf32>
    %c1 = arith.constant 1 : index
    %c0_8 = arith.constant 0 : index
    %c0_9 = arith.constant 0 : index
    %21 = vector.load %arg4[%c1, %c0_8, %c0_9] : memref<4x16x128xf32, #tpu.memory_space<vmem>>, vector<1x16x128xf32>
    %22 = vector.shape_cast %21 : vector<1x16x128xf32> to vector<16x128xf32>
    %cst_10 = arith.constant dense<0.000000e+00> : vector<128xf32>
    %23 = vector.multi_reduction <add>, %22, %cst_10 [0] : vector<16x128xf32> to vector<128xf32>
    %24 = vector.shape_cast %23 : vector<128xf32> to vector<1x128xf32>
    %25 = arith.mulf %6, %24 : vector<1x128xf32>
    %26 = vector.broadcast %25 : vector<1x128xf32> to vector<16x128xf32>
    %27 = arith.addf %26, %22 : vector<16x128xf32>
    %28 = vector.broadcast %11 : vector<1x128xf32> to vector<16x128xf32>
    %29 = arith.mulf %27, %28 : vector<16x128xf32>
    %c2 = arith.constant 2 : index
    %c0_11 = arith.constant 0 : index
    %c0_12 = arith.constant 0 : index
    %30 = vector.load %arg4[%c2, %c0_11, %c0_12] : memref<4x16x128xf32, #tpu.memory_space<vmem>>, vector<1x16x128xf32>
    %31 = vector.shape_cast %30 : vector<1x16x128xf32> to vector<16x128xf32>
    %cst_13 = arith.constant dense<0.000000e+00> : vector<128xf32>
    %32 = vector.multi_reduction <add>, %31, %cst_13 [0] : vector<16x128xf32> to vector<128xf32>
    %33 = vector.shape_cast %32 : vector<128xf32> to vector<1x128xf32>
    %34 = arith.mulf %6, %33 : vector<1x128xf32>
    %35 = vector.broadcast %34 : vector<1x128xf32> to vector<16x128xf32>
    %36 = arith.addf %35, %31 : vector<16x128xf32>
    %37 = vector.broadcast %11 : vector<1x128xf32> to vector<16x128xf32>
    %38 = arith.mulf %36, %37 : vector<16x128xf32>
    %c3 = arith.constant 3 : index
    %c0_14 = arith.constant 0 : index
    %c0_15 = arith.constant 0 : index
    %39 = vector.load %arg4[%c3, %c0_14, %c0_15] : memref<4x16x128xf32, #tpu.memory_space<vmem>>, vector<1x16x128xf32>
    %40 = vector.shape_cast %39 : vector<1x16x128xf32> to vector<16x128xf32>
    %cst_16 = arith.constant dense<0.000000e+00> : vector<128xf32>
    %41 = vector.multi_reduction <add>, %40, %cst_16 [0] : vector<16x128xf32> to vector<128xf32>
    %42 = vector.shape_cast %41 : vector<128xf32> to vector<1x128xf32>
    %43 = arith.mulf %6, %42 : vector<1x128xf32>
    %44 = vector.broadcast %43 : vector<1x128xf32> to vector<16x128xf32>
    %45 = arith.addf %44, %40 : vector<16x128xf32>
    %46 = vector.broadcast %11 : vector<1x128xf32> to vector<16x128xf32>
    %47 = arith.mulf %45, %46 : vector<16x128xf32>
    %c0_17 = arith.constant 0 : index
    %c0_18 = arith.constant 0 : index
    %48 = memref.load %arg1[%c0_17, %c0_18] : memref<4x4xf32, #tpu.memory_space<smem>>
    %49 = vector.broadcast %48 : f32 to vector<16x128xf32>
    %50 = arith.mulf %20, %49 : vector<16x128xf32>
    %c0_19 = arith.constant 0 : index
    %c1_20 = arith.constant 1 : index
    %51 = memref.load %arg1[%c0_19, %c1_20] : memref<4x4xf32, #tpu.memory_space<smem>>
    %52 = vector.broadcast %51 : f32 to vector<16x128xf32>
    %53 = arith.mulf %29, %52 : vector<16x128xf32>
    %c0_21 = arith.constant 0 : index
    %c2_22 = arith.constant 2 : index
    %54 = memref.load %arg1[%c0_21, %c2_22] : memref<4x4xf32, #tpu.memory_space<smem>>
    %55 = vector.broadcast %54 : f32 to vector<16x128xf32>
    %56 = arith.mulf %38, %55 : vector<16x128xf32>
    %c0_23 = arith.constant 0 : index
    %c3_24 = arith.constant 3 : index
    %57 = memref.load %arg1[%c0_23, %c3_24] : memref<4x4xf32, #tpu.memory_space<smem>>
    %58 = vector.broadcast %57 : f32 to vector<16x128xf32>
    %59 = arith.mulf %47, %58 : vector<16x128xf32>
    %60 = arith.addf %50, %53 : vector<16x128xf32>
    %61 = arith.addf %56, %59 : vector<16x128xf32>
    %62 = arith.addf %60, %61 : vector<16x128xf32>
    %c0_25 = arith.constant 0 : index
    %63 = memref.load %arg2[%c0_25] : memref<4xf32, #tpu.memory_space<smem>>
    %64 = vector.broadcast %63 : f32 to vector<16x128xf32>
    %65 = arith.addf %62, %64 : vector<16x128xf32>
    %cst_26 = arith.constant 0.000000e+00 : f32
    %66 = vector.broadcast %cst_26 : f32 to vector<16x128xf32>
    %67 = arith.maximumf %65, %66 : vector<16x128xf32>
    %c0_27 = arith.constant 0 : index
    %c0_28 = arith.constant 0 : index
    %c0_29 = arith.constant 0 : index
    %68 = vector.load %arg5[%c0_27, %c0_28, %c0_29] : memref<4x16x128xf32, #tpu.memory_space<vmem>>, vector<1x16x128xf32>
    %69 = vector.shape_cast %68 : vector<1x16x128xf32> to vector<16x128xf32>
    %70 = vector.shape_cast %67 : vector<16x128xf32> to vector<1x16x128xf32>
    tpu.vector_store %arg5[%c0_27, %c0_28, %c0_29], %70 {strides = array<i32>} : memref<4x16x128xf32, #tpu.memory_space<vmem>>, vector<1x16x128xf32>,
    %c1_30 = arith.constant 1 : index
    %c0_31 = arith.constant 0 : index
    %71 = memref.load %arg1[%c1_30, %c0_31] : memref<4x4xf32, #tpu.memory_space<smem>>
    %72 = vector.broadcast %71 : f32 to vector<16x128xf32>
    %73 = arith.mulf %20, %72 : vector<16x128xf32>
    %c1_32 = arith.constant 1 : index
    %c1_33 = arith.constant 1 : index
    %74 = memref.load %arg1[%c1_32, %c1_33] : memref<4x4xf32, #tpu.memory_space<smem>>
    %75 = vector.broadcast %74 : f32 to vector<16x128xf32>
    %76 = arith.mulf %29, %75 : vector<16x128xf32>
    %c1_34 = arith.constant 1 : index
    %c2_35 = arith.constant 2 : index
    %77 = memref.load %arg1[%c1_34, %c2_35] : memref<4x4xf32, #tpu.memory_space<smem>>
    %78 = vector.broadcast %77 : f32 to vector<16x128xf32>
    %79 = arith.mulf %38, %78 : vector<16x128xf32>
    %c1_36 = arith.constant 1 : index
    %c3_37 = arith.constant 3 : index
    %80 = memref.load %arg1[%c1_36, %c3_37] : memref<4x4xf32, #tpu.memory_space<smem>>
    %81 = vector.broadcast %80 : f32 to vector<16x128xf32>
    %82 = arith.mulf %47, %81 : vector<16x128xf32>
    %83 = arith.addf %73, %76 : vector<16x128xf32>
    %84 = arith.addf %79, %82 : vector<16x128xf32>
    %85 = arith.addf %83, %84 : vector<16x128xf32>
    %c1_38 = arith.constant 1 : index
    %86 = memref.load %arg2[%c1_38] : memref<4xf32, #tpu.memory_space<smem>>
    %87 = vector.broadcast %86 : f32 to vector<16x128xf32>
    %88 = arith.addf %85, %87 : vector<16x128xf32>
    %cst_39 = arith.constant 0.000000e+00 : f32
    %89 = vector.broadcast %cst_39 : f32 to vector<16x128xf32>
    %90 = arith.maximumf %88, %89 : vector<16x128xf32>
    %c1_40 = arith.constant 1 : index
    %c0_41 = arith.constant 0 : index
    %c0_42 = arith.constant 0 : index
    %91 = vector.load %arg5[%c1_40, %c0_41, %c0_42] : memref<4x16x128xf32, #tpu.memory_space<vmem>>, vector<1x16x128xf32>
    %92 = vector.shape_cast %91 : vector<1x16x128xf32> to vector<16x128xf32>
    %93 = vector.shape_cast %90 : vector<16x128xf32> to vector<1x16x128xf32>
    tpu.vector_store %arg5[%c1_40, %c0_41, %c0_42], %93 {strides = array<i32>} : memref<4x16x128xf32, #tpu.memory_space<vmem>>, vector<1x16x128xf32>,
    %c2_43 = arith.constant 2 : index
    %c0_44 = arith.constant 0 : index
    %94 = memref.load %arg1[%c2_43, %c0_44] : memref<4x4xf32, #tpu.memory_space<smem>>
    %95 = vector.broadcast %94 : f32 to vector<16x128xf32>
    %96 = arith.mulf %20, %95 : vector<16x128xf32>
    %c2_45 = arith.constant 2 : index
    %c1_46 = arith.constant 1 : index
    %97 = memref.load %arg1[%c2_45, %c1_46] : memref<4x4xf32, #tpu.memory_space<smem>>
    %98 = vector.broadcast %97 : f32 to vector<16x128xf32>
    %99 = arith.mulf %29, %98 : vector<16x128xf32>
    %c2_47 = arith.constant 2 : index
    %c2_48 = arith.constant 2 : index
    %100 = memref.load %arg1[%c2_47, %c2_48] : memref<4x4xf32, #tpu.memory_space<smem>>
    %101 = vector.broadcast %100 : f32 to vector<16x128xf32>
    %102 = arith.mulf %38, %101 : vector<16x128xf32>
    %c2_49 = arith.constant 2 : index
    %c3_50 = arith.constant 3 : index
    %103 = memref.load %arg1[%c2_49, %c3_50] : memref<4x4xf32, #tpu.memory_space<smem>>
    %104 = vector.broadcast %103 : f32 to vector<16x128xf32>
    %105 = arith.mulf %47, %104 : vector<16x128xf32>
    %106 = arith.addf %96, %99 : vector<16x128xf32>
    %107 = arith.addf %102, %105 : vector<16x128xf32>
    %108 = arith.addf %106, %107 : vector<16x128xf32>
    %c2_51 = arith.constant 2 : index
    %109 = memref.load %arg2[%c2_51] : memref<4xf32, #tpu.memory_space<smem>>
    %110 = vector.broadcast %109 : f32 to vector<16x128xf32>
    %111 = arith.addf %108, %110 : vector<16x128xf32>
    %cst_52 = arith.constant 0.000000e+00 : f32
    %112 = vector.broadcast %cst_52 : f32 to vector<16x128xf32>
    %113 = arith.maximumf %111, %112 : vector<16x128xf32>
    %c2_53 = arith.constant 2 : index
    %c0_54 = arith.constant 0 : index
    %c0_55 = arith.constant 0 : index
    %114 = vector.load %arg5[%c2_53, %c0_54, %c0_55] : memref<4x16x128xf32, #tpu.memory_space<vmem>>, vector<1x16x128xf32>
    %115 = vector.shape_cast %114 : vector<1x16x128xf32> to vector<16x128xf32>
    %116 = vector.shape_cast %113 : vector<16x128xf32> to vector<1x16x128xf32>
    tpu.vector_store %arg5[%c2_53, %c0_54, %c0_55], %116 {strides = array<i32>} : memref<4x16x128xf32, #tpu.memory_space<vmem>>, vector<1x16x128xf32>,
    %c3_56 = arith.constant 3 : index
    %c0_57 = arith.constant 0 : index
    %117 = memref.load %arg1[%c3_56, %c0_57] : memref<4x4xf32, #tpu.memory_space<smem>>
    %118 = vector.broadcast %117 : f32 to vector<16x128xf32>
    %119 = arith.mulf %20, %118 : vector<16x128xf32>
    %c3_58 = arith.constant 3 : index
    %c1_59 = arith.constant 1 : index
    %120 = memref.load %arg1[%c3_58, %c1_59] : memref<4x4xf32, #tpu.memory_space<smem>>
    %121 = vector.broadcast %120 : f32 to vector<16x128xf32>
    %122 = arith.mulf %29, %121 : vector<16x128xf32>
    %c3_60 = arith.constant 3 : index
    %c2_61 = arith.constant 2 : index
    %123 = memref.load %arg1[%c3_60, %c2_61] : memref<4x4xf32, #tpu.memory_space<smem>>
    %124 = vector.broadcast %123 : f32 to vector<16x128xf32>
    %125 = arith.mulf %38, %124 : vector<16x128xf32>
    %c3_62 = arith.constant 3 : index
    %c3_63 = arith.constant 3 : index
    %126 = memref.load %arg1[%c3_62, %c3_63] : memref<4x4xf32, #tpu.memory_space<smem>>
    %127 = vector.broadcast %126 : f32 to vector<16x128xf32>
    %128 = arith.mulf %47, %127 : vector<16x128xf32>
    %129 = arith.addf %119, %122 : vector<16x128xf32>
    %130 = arith.addf %125, %128 : vector<16x128xf32>
    %131 = arith.addf %129, %130 : vector<16x128xf32>
    %c3_64 = arith.constant 3 : index
    %132 = memref.load %arg2[%c3_64] : memref<4xf32, #tpu.memory_space<smem>>
    %133 = vector.broadcast %132 : f32 to vector<16x128xf32>
    %134 = arith.addf %131, %133 : vector<16x128xf32>
    %cst_65 = arith.constant 0.000000e+00 : f32
    %135 = vector.broadcast %cst_65 : f32 to vector<16x128xf32>
    %136 = arith.maximumf %134, %135 : vector<16x128xf32>
    %c3_66 = arith.constant 3 : index
    %c0_67 = arith.constant 0 : index
    %c0_68 = arith.constant 0 : index
    %137 = vector.load %arg5[%c3_66, %c0_67, %c0_68] : memref<4x16x128xf32, #tpu.memory_space<vmem>>, vector<1x16x128xf32>
    %138 = vector.shape_cast %137 : vector<1x16x128xf32> to vector<16x128xf32>
    %139 = vector.shape_cast %136 : vector<16x128xf32> to vector<1x16x128xf32>
    tpu.vector_store %arg5[%c3_66, %c0_67, %c0_68], %139 {strides = array<i32>} : memref<4x16x128xf32, #tpu.memory_space<vmem>>, vector<1x16x128xf32>,
    return
  }
  func.func @transform_0(%arg0: i32) -> (i32, i32) {
    %c0_i32 = arith.constant 0 : i32
    %c0_i32_0 = arith.constant 0 : i32
    %c0_i32_1 = arith.constant 0 : i32
    return %c0_i32, %c0_i32_0 : i32, i32
  }
  func.func @transform_1(%arg0: i32) -> i32 {
    %c0_i32 = arith.constant 0 : i32
    %c0_i32_0 = arith.constant 0 : i32
    return %c0_i32 : i32
  }
  func.func @transform_2(%arg0: i32) -> (i32, i32) {
    %c0_i32 = arith.constant 0 : i32
    %c0_i32_0 = arith.constant 0 : i32
    return %c0_i32, %arg0 : i32, i32
  }
  func.func @transform_3(%arg0: i32) -> (i32, i32, i32) {
    %c0_i32 = arith.constant 0 : i32
    %c0_i32_0 = arith.constant 0 : i32
    %c0_i32_1 = arith.constant 0 : i32
    return %c0_i32, %c0_i32_0, %arg0 : i32, i32, i32
  }
  func.func @transform_4(%arg0: i32) -> (i32, i32, i32) {
    %c0_i32 = arith.constant 0 : i32
    %c0_i32_0 = arith.constant 0 : i32
    %c0_i32_1 = arith.constant 0 : i32
    return %c0_i32, %c0_i32_0, %arg0 : i32, i32, i32
  }
}

</mosaic_0001>

<bundles_post_ra>
// kernel: tpu_custom_call.1
= control target key start
LH: loop header
LB: loop body
LE: loop exit
PB: predicated region body
PF: predicated region fallthrough
CT: control target
= control target key end

     0   :  { %9 = vsyncpa [#allocation5], 0  ;;  %s661_s0 = inlined_call_operand.hbm [shape: f32[4,4], index: 0, kind: input, shape index: {}]   ;;  %s662_s1 = inlined_call_operand.hbm [shape: f32[4], index: 1, kind: input, shape index: {}]   ;;  %s663_s2 = inlined_call_operand.hbm [shape: f32[16,128], index: 2, kind: input, shape index: {}]   ;;  %s664_s3 = inlined_call_operand.hbm [shape: f32[4,16,128], index: 3, kind: input, shape index: {}]   ;;  %s665_s4 = inlined_call_operand.hbm [shape: f32[4,16,128], index: 4, kind: output, shape index: {}]  }
   0x1   :  { %10 = vsyncpa [#allocation7], 0 }
   0x2   :  { %11 = vsyncpa [#allocation3], 0 }
   0x3   :  { %12 = vsyncpa [#allocation10], 0 }
   0x4   :  { %13 = vsyncpa [#allocation4], 0  ;;  %s19_s17 = sshll.u32 %s661_s0, 4  ;;  %s28_s20 = sshll.u32 %s662_s1, 4  ;;  %s20_s17 = int_to_ptr.hbm [resolvable:$true] %s19_s17  ;;  %s29_s20 = int_to_ptr.hbm [resolvable:$true] %s28_s20 }
   0x5   :  { %s447_s21 = smov [#allocation2]   ;;  %s448_s22 = smov [#allocation6]  }
   0x6   :  { %22 = dma.hbm_to_smem %s20_s17, 64, %s447_s21, [#allocation5]  }
   0x7   :  { %31 = dma.hbm_to_smem %s29_s20, 16, %s448_s22, [#allocation7]  }
   0x8   :  { %s36_s25 = sshll.u32 %s663_s2, 4  ;;  %s449_s26 = smov [#allocation8]   ;;  %s37_s25 = int_to_ptr.hbm [resolvable:$true] %s36_s25 }
   0x9   :  { %s38_s27 = sshll.u32 %s449_s26, 4  ;;  %s49_s29 = sshll.u32 %s664_s3, 4  ;;  %s39_s27 = int_to_ptr.vmem [resolvable:$true] %s38_s27  ;;  %s50_s29 = int_to_ptr.hbm [resolvable:$true] %s49_s29 }
   0xa   :  { %s450_s30 = smov 128   ;;  %s451_s5 = smov 8  }
   0xb   :  { %44 = dma.hbm_to_vmem [thread:$0]  %s37_s25, 256, %s39_s27, [#allocation3], %s450_s30, %s450_s30, %s451_s5  }
   0xc   :  { %s452_s1 = smov [#allocation9]  }
   0xd   :  { %s51_s6 = sshll.u32 %s452_s1, 4  ;;  %s52_s6 = int_to_ptr.vmem [resolvable:$true] %s51_s6 }
   0xe   :  { %57 = dma.hbm_to_vmem [thread:$0]  %s50_s29, 1024, %s52_s6, [#allocation10], %s450_s30, %s450_s30, %s451_s5  }
   0xf   :  { %437 = dma.done.wait [#allocation5], 64  }
  0x10   :  { %438 = vsyncadd [#allocation5], 4294967232 }
  0x11   :  { %439 = dma.done.wait [#allocation7], 16  }
  0x12   :  { %440 = vsyncadd [#allocation7], 4294967280 }
  0x13   :  { %441 = dma.done.wait [#allocation3], 256  }
  0x14   :  { %442 = vsyncadd [#allocation3], 4294967040 }
  0x15   :  { %443 = dma.done.wait [#allocation10], 1024  }
  0x16   :  { %444 = vsyncadd [#allocation10], 4294966272 }
  0x17   :  { %74 = sfence }
  0x18   :  { %v75_v0 = vld [vmem:[#allocation8] sm:$0xff]  ;;  %v76_v1 = vld [vmem:[#allocation8 + $0x8] sm:$0xff]  ;;  %v497_v2 = vld [vmem:[#allocation9] sm:$0xff]  ;;  %s521_s2 = sld [smem:[#allocation2]]  ;;  %s453_s25 = smov [#allocation11]  }
  0x19   :  { %335 = vtanh.f32 %v75_v0  ;;  %v499_v3 = vld [vmem:[#allocation9 + $0x8] sm:$0xff]  ;;  %v501_v5 = vld [vmem:[#allocation9 + $0x10] sm:$0xff]  ;;  %v503_v6 = vld [vmem:[#allocation9 + $0x18] sm:$0xff]  ;;  %s523_s3 = sld [smem:[#allocation2 + $0x1]]  ;;  %s292_s26 = sshll.u32 %s453_s25, 4  ;;  %s293_s26 = int_to_ptr.vmem [resolvable:$true] %s292_s26 }
  0x1a   :  { %337 = vtanh.f32 %v76_v1  ;;  %v505_v7 = vld [vmem:[#allocation9 + $0x20] sm:$0xff]  ;;  %v507_v10 = vld [vmem:[#allocation9 + $0x28] sm:$0xff]  ;;  %v509_v11 = vld [vmem:[#allocation9 + $0x30] sm:$0xff]  ;;  %v108_v15 = vadd.f32 %v499_v3, %v497_v2  ;;  %v123_v17 = vadd.f32 %v503_v6, %v501_v5  ;;  %s525_s7 = sld [smem:[#allocation2 + $0x2]]  ;;  %s294_s0 = sshll.u32 %s665_s4, 4  ;;  %s295_s0 = int_to_ptr.hbm [resolvable:$true] %s294_s0 }
  0x1b   :  { %v511_v12 = vld [vmem:[#allocation9 + $0x38] sm:$0xff]  ;;  %v138_v18 = vadd.f32 %v507_v10, %v505_v7  ;;  %s527_s8 = sld [smem:[#allocation2 + $0x3]] }
  0x1c   :  { %v153_v19 = vadd.f32 %v511_v12, %v509_v11  ;;  %v109_v21 = vrot.slane %v108_v15, 4  ;;  %v124_v23 = vrot.slane %v123_v17, 4  ;;  %s529_s9 = sld [smem:[#allocation6]] }
  0x1d   :  { %v139_v24 = vrot.slane %v138_v18, 4  ;;  %s531_s10 = sld [smem:[#allocation2 + $0x80]] }
  0x1e   :  { %v154_v25 = vrot.slane %v153_v19, 4  ;;  %v110_v27 = vadd.f32 %v109_v21, %v108_v15  ;;  %v125_v29 = vadd.f32 %v124_v23, %v123_v17  ;;  %s533_s11 = sld [smem:[#allocation2 + $0x81]]  ;;  %v166_v54 = vstv %s521_s2 }
  0x1f   :  { %v336_v4 = vpop.eup %335  ;;  %v140_v30 = vadd.f32 %v139_v24, %v138_v18  ;;  %s535_s12 = sld [smem:[#allocation2 + $0x82]]  ;;  %v170_v55 = vstv %s523_s3 }
  0x20   :  { %v338_v8 = vpop.eup %337  ;;  %v79_v9 = vmax.f32 %v336_v4, 0.0  ;;  %v155_v31 = vadd.f32 %v154_v25, %v153_v19  ;;  %v111_v33 = vrot.slane %v110_v27, 2  ;;  %v126_v35 = vrot.slane %v125_v29, 2  ;;  %s537_s13 = sld [smem:[#allocation2 + $0x83]] }
  0x21   :  { %v80_v13 = vmax.f32 %v338_v8, 0.0  ;;  %v141_v36 = vrot.slane %v140_v30, 2  ;;  %s539_s14 = sld [smem:[#allocation6 + $0x1]]  ;;  %v174_v56 = vstv %s525_s7  ;;  %v178_v59 = vstv %s527_s8 }
  0x22   :  { %v81_v14 = vmul.f32 %v79_v9, %v79_v9  ;;  %v156_v37 = vrot.slane %v155_v31, 2  ;;  %v112_v39 = vadd.f32 %v111_v33, %v110_v27  ;;  %v127_v41 = vadd.f32 %v126_v35, %v125_v29  ;;  %s541_s15 = sld [smem:[#allocation2 + $0x100]] }
  0x23   :  { %v82_v16 = vmul.f32 %v80_v13, %v80_v13  ;;  %v142_v42 = vadd.f32 %v141_v36, %v140_v30  ;;  %s543_s16 = sld [smem:[#allocation2 + $0x101]]  ;;  %v196_v60 = vstv %s531_s10  ;;  %v188_v8 = vstv %s529_s9 }
  0x24   :  { %v157_v43 = vadd.f32 %v156_v37, %v155_v31  ;;  %v113_v45 = vrot.slane %v112_v39, 1  ;;  %v128_v46 = vrot.slane %v127_v41, 1  ;;  %s545_s17 = sld [smem:[#allocation2 + $0x102]]  ;;  %v200_v9 = vstv %s533_s11 }
  0x25   :  { %v83_v20 = vadd.f32 %v82_v16, %v81_v14  ;;  %v143_v47 = vrot.slane %v142_v42, 1  ;;  %s547_s18 = sld [smem:[#allocation2 + $0x103]]  ;;  %v204_v13 = vstv %s535_s12 }
  0x26   :  { %v158_v48 = vrot.slane %v157_v43, 1  ;;  %v114_v49 = vadd.f32 %v113_v45, %v112_v39  ;;  %v129_v50 = vadd.f32 %v128_v46, %v127_v41  ;;  %s549_s19 = sld [smem:[#allocation6 + $0x2]]  ;;  %v208_v14 = vstv %s537_s13 }
  0x27   :  { %v84_v22 = vrot.slane %v83_v20, 4  ;;  %v144_v51 = vadd.f32 %v143_v47, %v142_v42  ;;  %s551_s20 = sld [smem:[#allocation2 + $0x180]]  ;;  %v218_v30 = vstv %s539_s14 }
  0x28   :  { %v159_v52 = vadd.f32 %v158_v48, %v157_v43  ;;  %s556_s21 = sld [smem:[#allocation2 + $0x181]]  ;;  %v227_v16 = vstv %s541_s15 }
  0x29   :  { %v85_v26 = vadd.f32 %v84_v22, %v83_v20  ;;  %s560_s22 = sld [smem:[#allocation2 + $0x182]]  ;;  %v231_v17 = vstv %s543_s16 }
  0x2a   :  { %s562_s23 = sld [smem:[#allocation2 + $0x183]]  ;;  %v235_v18 = vstv %s545_s17 }
  0x2b   :  { %v86_v28 = vrot.slane %v85_v26, 2  ;;  %v239_v23 = vstv %s547_s18  ;;  %s614_s24 = sld [smem:[#allocation6 + $0x3]] }
  0x2d   :  { %v87_v32 = vadd.f32 %v86_v28, %v85_v26  ;;  %v258_v31 = vstv %s551_s20 }
  0x2f   :  { %v88_v34 = vrot.slane %v87_v32, 1  ;;  %v266_v35 = vstv %s560_s22 }
  0x31   :  { %v89_v38 = vadd.f32 %v88_v34, %v87_v32  ;;  %v262_v32 = vstv %s556_s21  ;;  %v249_v34 = vstv %s549_s19 }
  0x33   :  { %v90_v40 = vmul.f32 16.0, %v89_v38  ;;  %v115_v58 = vmul.f32 %v114_v49, %v89_v38  ;;  %v130_v62 = vmul.f32 %v129_v50, %v89_v38  ;;  %v145_v63 = vmul.f32 %v144_v51, %v89_v38 }
  0x34   :  { %v160_v0 = vmul.f32 %v159_v52, %v89_v38 }
  0x35   :  { %v91_v44 = vadd.f32 1.0, %v90_v40  ;;  %v116_v21 = vadd.f32 %v115_v58, %v497_v2  ;;  %v131_v22 = vadd.f32 %v130_v62, %v501_v5  ;;  %v146_v25 = vadd.f32 %v145_v63, %v505_v7 }
  0x36   :  { %v161_v26 = vadd.f32 %v160_v0, %v509_v11  ;;  %v117_v27 = vadd.f32 %v115_v58, %v499_v3  ;;  %v132_v28 = vadd.f32 %v130_v62, %v503_v6  ;;  %v147_v29 = vadd.f32 %v145_v63, %v507_v10 }
  0x37   :  { %339 = vrcp.f32 %v91_v44  ;;  %v103_v61 = vand.u32 2147483648, %v91_v44  ;;  %vm97_vm0 = vweird.f32 %v91_v44  ;;  %v101_v4 = vand.u32 2147483647, %v91_v44 }
  0x38   :  { %v162_v2 = vadd.f32 %v160_v0, %v511_v12  ;;  %v270_v7 = vstv %s562_s23 }
  0x39   :  { %v104_v20 = vor.u32 1.1754944e-38, %v103_v61  ;;  %vm102_vm3 = vcmp.eq.f32.partialorder %v101_v4, 8.507059e+37 }
  0x3d   :  { %v340_v53 = vpop.eup %339 }
  0x3e   :  { %v93_v57 = vmul.f32 %v340_v53, %v91_v44  ;;  %vm98_vm1 = vweird.f32 %v340_v53 }
  0x3f   :  { %vm571_vm2 = vmor %vm97_vm0, %vm98_vm1 }
  0x40   :  { %v94_v1 = vsub.f32 1.0, %v93_v57 }
  0x42   :  { %v95_v15 = vmul.f32 %v340_v53, %v94_v1 }
  0x44   :  { %v96_v24 = vadd.f32 %v340_v53, %v95_v15 }
  0x46   :  { %v100_v5 = vsel %vm571_vm2, %v340_v53, %v96_v24 }
  0x47   :  { %v105_v33 = vsel %vm102_vm3, %v104_v20, %v100_v5 }
  0x48   :  { %v118_v36 = vmul.f32 %v116_v21, %v105_v33  ;;  %v133_v11 = vmul.f32 %v131_v22, %v105_v33  ;;  %v148_v37 = vmul.f32 %v146_v25, %v105_v33  ;;  %v163_v3 = vmul.f32 %v161_v26, %v105_v33 }
  0x49   :  { %v119_v6 = vmul.f32 %v117_v27, %v105_v33  ;;  %v134_v38 = vmul.f32 %v132_v28, %v105_v33  ;;  %v592_v10 = vmul.f32 %v147_v29, %v105_v33  ;;  %v594_v12 = vmul.f32 %v162_v2, %v105_v33 }
  0x4a   :  { %v167_v39 = vmul.f32 %v166_v54, %v118_v36  ;;  %v171_v40 = vmul.f32 %v170_v55, %v133_v11  ;;  %v175_v41 = vmul.f32 %v174_v56, %v148_v37  ;;  %v179_v42 = vmul.f32 %v178_v59, %v163_v3 }
  0x4b   :  { %v168_v43 = vmul.f32 %v166_v54, %v119_v6  ;;  %v172_v44 = vmul.f32 %v170_v55, %v134_v38  ;;  %v176_v45 = vmul.f32 %v174_v56, %v592_v10  ;;  %v180_v46 = vmul.f32 %v178_v59, %v594_v12 }
  0x4c   :  { %v181_v47 = vadd.f32 %v171_v40, %v167_v39  ;;  %v183_v48 = vadd.f32 %v179_v42, %v175_v41  ;;  %v197_v49 = vmul.f32 %v196_v60, %v118_v36  ;;  %v201_v50 = vmul.f32 %v200_v9, %v133_v11 }
  0x4d   :  { %v182_v51 = vadd.f32 %v172_v44, %v168_v43  ;;  %v184_v52 = vadd.f32 %v180_v46, %v176_v45  ;;  %v205_v53 = vmul.f32 %v204_v13, %v148_v37  ;;  %v209_v57 = vmul.f32 %v208_v14, %v163_v3 }
  0x4e   :  { %v185_v54 = vadd.f32 %v183_v48, %v181_v47  ;;  %v211_v55 = vadd.f32 %v201_v50, %v197_v49  ;;  %v198_v56 = vmul.f32 %v196_v60, %v119_v6  ;;  %v202_v58 = vmul.f32 %v200_v9, %v134_v38 }
  0x4f   :  { %v186_v59 = vadd.f32 %v184_v52, %v182_v51  ;;  %v213_v61 = vadd.f32 %v209_v57, %v205_v53  ;;  %v206_v62 = vmul.f32 %v204_v13, %v592_v10  ;;  %v210_v63 = vmul.f32 %v208_v14, %v594_v12 }
  0x50   :  { %v189_v0 = vadd.f32 %v188_v8, %v185_v54  ;;  %v212_v1 = vadd.f32 %v202_v58, %v198_v56  ;;  %v228_v4 = vmul.f32 %v227_v16, %v118_v36  ;;  %v232_v15 = vmul.f32 %v231_v17, %v133_v11 }
  0x51   :  { %v190_v60 = vadd.f32 %v188_v8, %v186_v59  ;;  %v215_v9 = vadd.f32 %v213_v61, %v211_v55  ;;  %v214_v19 = vadd.f32 %v210_v63, %v206_v62  ;;  %v236_v13 = vmul.f32 %v235_v18, %v148_v37 }
  0x52   :  { %v191_v14 = vmax.f32 %v189_v0, 0.0  ;;  %v240_v20 = vmul.f32 %v239_v23, %v163_v3  ;;  %v242_v21 = vadd.f32 %v232_v15, %v228_v4  ;;  %v229_v22 = vmul.f32 %v227_v16, %v119_v6 }
  0x53   :  { %v192_v24 = vmax.f32 %v190_v60, 0.0  ;;  %v219_v8 = vadd.f32 %v218_v30, %v215_v9  ;;  %v216_v25 = vadd.f32 %v214_v19, %v212_v1  ;;  %v233_v26 = vmul.f32 %v231_v17, %v134_v38 }
  0x54   :  { %193 = vst [vmem:[#allocation11] sm:$0xff] %v191_v14  ;;  %v244_v27 = vadd.f32 %v240_v20, %v236_v13  ;;  %v237_v28 = vmul.f32 %v235_v18, %v592_v10  ;;  %v241_v29 = vmul.f32 %v239_v23, %v594_v12  ;;  %v259_v16 = vmul.f32 %v258_v31, %v118_v36 }
  0x55   :  { %194 = vst [vmem:[#allocation11 + $0x8] sm:$0xff] %v192_v24  ;;  %v221_v2 = vmax.f32 %v219_v8, 0.0  ;;  %v220_v5 = vadd.f32 %v218_v30, %v216_v25  ;;  %v243_v33 = vadd.f32 %v233_v26, %v229_v22  ;;  %v263_v17 = vmul.f32 %v262_v32, %v133_v11 }
  0x56   :  { %v246_v39 = vadd.f32 %v244_v27, %v242_v21  ;;  %v245_v40 = vadd.f32 %v241_v29, %v237_v28  ;;  %v267_v18 = vmul.f32 %v266_v35, %v148_v37  ;;  %v271_v23 = vmul.f32 %v270_v7, %v163_v3 }
  0x57   :  { %224 = vst [vmem:[#allocation11 + $0x10] sm:$0xff] %v221_v2  ;;  %v222_v41 = vmax.f32 %v220_v5, 0.0  ;;  %v273_v36 = vadd.f32 %v263_v17, %v259_v16  ;;  %v260_v42 = vmul.f32 %v258_v31, %v119_v6  ;;  %v264_v43 = vmul.f32 %v262_v32, %v134_v38 }
  0x58   :  { %v250_v30 = vadd.f32 %v249_v34, %v246_v39  ;;  %v247_v44 = vadd.f32 %v245_v40, %v243_v33  ;;  %v275_v45 = vadd.f32 %v271_v23, %v267_v18  ;;  %v268_v11 = vmul.f32 %v266_v35, %v592_v10 }
  0x59   :  { %225 = vst [vmem:[#allocation11 + $0x18] sm:$0xff] %v222_v41  ;;  %v280_v46 = vstv %s614_s24  ;;  %v272_v37 = vmul.f32 %v270_v7, %v594_v12  ;;  %v274_v3 = vadd.f32 %v264_v43, %v260_v42 }
  0x5a   :  { %v252_v47 = vmax.f32 %v250_v30, 0.0  ;;  %v251_v48 = vadd.f32 %v249_v34, %v247_v44  ;;  %v277_v49 = vadd.f32 %v275_v45, %v273_v36 }
  0x5b   :  { %v276_v31 = vadd.f32 %v272_v37, %v268_v11 }
  0x5c   :  { %255 = vst [vmem:[#allocation11 + $0x20] sm:$0xff] %v252_v47  ;;  %v253_v32 = vmax.f32 %v251_v48, 0.0  ;;  %v281_v6 = vadd.f32 %v280_v46, %v277_v49 }
  0x5d   :  { %v278_v38 = vadd.f32 %v276_v31, %v274_v3 }
  0x5e   :  { %256 = vst [vmem:[#allocation11 + $0x28] sm:$0xff] %v253_v32  ;;  %v283_v50 = vmax.f32 %v281_v6, 0.0 }
  0x5f   :  { %v282_v35 = vadd.f32 %v280_v46, %v278_v38 }
  0x60   :  { %286 = vst [vmem:[#allocation11 + $0x30] sm:$0xff] %v283_v50 }
  0x61   :  { %v284_v7 = vmax.f32 %v282_v35, 0.0 }
  0x63   :  { %287 = vst [vmem:[#allocation11 + $0x38] sm:$0xff] %v284_v7 }
  0x64   :  { %300 = dma.vmem_to_hbm [thread:$0]  %s293_s26, 1024, %s295_s0, [#allocation4], %s450_s30, %s450_s30, %s451_s5  }
  0x65   :  { %445 = dma.done.wait [#allocation4], 1024  }
  0x66   :  { %446 = vsyncadd [#allocation4], 4294966272 }
  0x67   :  { %305 = vsyncpa [#allocation3], 1 }
  0x68   :  { %306 = vsyncpa [#allocation10], 1 }
  0x69   :  { %307 = vsyncpa [#allocation4], 1 }
  0x6a   :  { %308 = vsyncpa [#allocation5], 1 }
  0x6b   :  { %309 = vsyncpa [#allocation7], 1 }

</bundles_post_ra>
